<compile_context>
chip_gen: v7x
topology: tpu7x:2x2x1
jax: 0.10.0
libtpu: 0.0.40
codegen_flags: <defaults>
</compile_context>

<pallas_src>
import functools

import numpy as np
import jax
import jax.numpy as jnp
from jax import lax
from jax.experimental import pallas as pl
from jax.experimental.pallas import tpu as pltpu


def _round_up(x, m):
    return (x + m - 1) // m * m


def _vmem_limit(est_bytes, *, cap=48 * 1024 * 1024, floor=4 * 1024 * 1024):
    """Scoped-VMEM request: computed need with headroom, capped for v7x (64 MiB/TC)."""
    return int(min(cap, max(floor, 3 * int(est_bytes))))


# -----------------------------------------------------------------------------
# Kernel 1: fused 1x1 conv (BN scale pre-folded into weights) + bias + SiLU
# -----------------------------------------------------------------------------
def _conv1x1_bias_silu_kernel(x_ref, w_ref, b_ref, o_ref):
    # x_ref: (tm, Cin) bf16, w_ref: (Cin, Cout) bf16, b_ref: (1, Cout) f32
    acc = jnp.dot(x_ref[...], w_ref[...], preferred_element_type=jnp.float32)
    z = acc + b_ref[...]                       # BN bias (scale already folded in w)
    o_ref[...] = (z * jax.nn.sigmoid(z)).astype(o_ref.dtype)


def conv1x1_bias_silu(x2, w_bf16, bias, *, out_dtype, tm=1024):
    """x2: (M, Cin) bf16, w_bf16: (Cin, Cout) bf16 (scale-folded), bias: (Cout,) f32."""
    M, Cin = x2.shape
    Cout = w_bf16.shape[1]
    # Large MXU-friendly tile; no HBM-side padding -- cdiv grid, Pallas masks the
    # partial last block (safe: each output row depends only on its own input row).
    tm = min(tm, _round_up(M, 256))
    grid_m = pl.cdiv(M, tm)
    ob = jnp.dtype(out_dtype).itemsize
    est = (2 * tm * Cin * 2          # x blocks (double-buffered, bf16)
           + 2 * Cin * Cout * 2      # weights
           + 2 * tm * Cout * ob      # out blocks
           + 2 * Cout * 4)           # bias
    return pl.pallas_call(
        _conv1x1_bias_silu_kernel,
        out_shape=jax.ShapeDtypeStruct((M, Cout), out_dtype),
        grid=(grid_m,),
        in_specs=[
            pl.BlockSpec((tm, Cin), lambda i: (i, 0)),
            pl.BlockSpec((Cin, Cout), lambda i: (0, 0)),
            pl.BlockSpec((1, Cout), lambda i: (0, 0)),
        ],
        out_specs=pl.BlockSpec((tm, Cout), lambda i: (i, 0)),
        compiler_params=pltpu.CompilerParams(
            dimension_semantics=("parallel",),
            vmem_limit_bytes=_vmem_limit(est),
        ),
    )(x2, w_bf16, bias.reshape(1, Cout))


# -----------------------------------------------------------------------------
# Kernel 2: fused cascaded max-pools (5 -> 9 -> 13) + concat-free cv2 + SiLU
# -----------------------------------------------------------------------------
def _maxpool5_same(src, pad_ref, H, W):
    """5x5 'same' max pool (stride 1, pad 2) of an (H, W, C) value.

    Width pass: writes the interior of the (H, W+4, C) scratch whose 2-wide
    column borders were pre-set to -inf once per grid step (border-only init),
    then takes 5 shifted-window maxima.  Height pass: done purely on values --
    leading-axis concat/slices are cheap vreg re-indexing (no scratch, no pad
    buffer round trip for this axis)."""
    # width pass
    pad_ref[:, 2:W + 2, :] = src                 # borders stay -inf
    xp = pad_ref[...]                            # (H, W+4, C)
    m = xp[:, 0:W]
    for d in range(1, 5):
        m = jnp.maximum(m, xp[:, d:d + W])
    # height pass (leading axis)
    neg_rows = jnp.full((2,) + m.shape[1:], -jnp.inf, m.dtype)
    mp = jnp.concatenate([neg_rows, m, neg_rows], axis=0)    # (H+4, W, C)
    out = mp[0:H]
    for d in range(1, 5):
        out = jnp.maximum(out, mp[d:d + H])
    return out                                   # (H, W, C)


def _spp_pool_cv2_kernel(y_ref, wy_ref, w5_ref, w9_ref, w13_ref, b_ref,
                         o_ref, pad_ref, acc_ref, *, H, W):
    k = pl.program_id(2)                         # channel-block (reduction) axis

    @pl.when(k == 0)
    def _():
        acc_ref[...] = jnp.zeros_like(acc_ref)

    y = y_ref[0]                                 # (H, W, cb) bf16
    cbw = y.shape[-1]

    # Border-only -inf init of the width-pass pad scratch (interior writes never
    # touch columns [0:2] / [W+2:W+4]).  Done every step -- cheap, and safe with
    # megacore-parallel grid axes (scratch is per-TensorCore).
    strip = jnp.full((H, 2, cbw), -jnp.inf, pad_ref.dtype)
    pad_ref[:, 0:2, :] = strip
    pad_ref[:, W + 2:W + 4, :] = strip

    # Cascaded-5 identity: mp9 = mp5(mp5), mp13 = mp5(mp5(mp5)) with 'same' -inf pad.
    p5 = _maxpool5_same(y, pad_ref, H, W)
    p9 = _maxpool5_same(p5, pad_ref, H, W)
    p13 = _maxpool5_same(p9, pad_ref, H, W)

    hw = H * W

    def mm(a, wr):
        # NOTE: the (H, W) -> H*W merge is layout-free when W % 8 == 0; for
        # W not a multiple of 8 it may cost one sublane relayout per operand.
        return jnp.dot(a.reshape(hw, cbw), wr[...],
                       preferred_element_type=jnp.float32)

    # concat-free cv2: sequential accumulation (no 4 live (hw, c2) f32 temps).
    acc_ref[...] += mm(y, wy_ref)
    acc_ref[...] += mm(p5, w5_ref)
    acc_ref[...] += mm(p9, w9_ref)
    acc_ref[...] += mm(p13, w13_ref)

    @pl.when(k == pl.num_programs(2) - 1)
    def _():
        z = acc_ref[...] + b_ref[...]
        o_ref[0] = (z * jax.nn.sigmoid(z)).astype(o_ref.dtype)


def _pick_cblock(c_, c2b):
    # Prefer cb == c_ (weights fetched once, constant block index); only fall
    # back to channel-blocking if the 4 double-buffered weight tiles get large.
    if 4 * c_ * c2b * 2 * 2 <= 16 * 1024 * 1024:
        return c_
    for cand in (512, 256, 128):
        if c_ % cand == 0:
            return cand
    return c_


def _pick_c2_blocks(N, c2):
    # v7x megacore: ensure the 'parallel' part of the grid has >= 2 iterations at
    # batch 1 by splitting c2 (keep lane-dense >= 128-wide output blocks).  The
    # pooling gets recomputed per c2 block -- acceptable trade for 2 TensorCores.
    if N == 1 and c2 % 256 == 0:
        return 2
    return 1


def spp_pool_cv2(y_nhwc, w2_splits_bf16, bias2, *, out_dtype=jnp.bfloat16):
    """y_nhwc: (N, H, W, c_) bf16; w2_splits: 4x (c_, c2) bf16; returns (N, H*W, c2)."""
    N, H, W, c_ = y_nhwc.shape
    c2 = w2_splits_bf16[0].shape[1]
    n_j = _pick_c2_blocks(N, c2)
    c2b = c2 // n_j
    cb = _pick_cblock(c_, c2b)
    n_cb = c_ // cb
    ob = jnp.dtype(out_dtype).itemsize

    y_spec = pl.BlockSpec((1, H, W, cb), lambda n, j, k: (n, 0, 0, k))
    w_spec = pl.BlockSpec((cb, c2b), lambda n, j, k: (k, j))
    b_spec = pl.BlockSpec((1, c2b), lambda n, j, k: (0, j))
    out_spec = pl.BlockSpec((1, H * W, c2b), lambda n, j, k: (n, 0, j))

    est = (2 * H * W * cb * 2            # y blocks (double-buffered)
           + 8 * cb * c2b * 2            # 4 weight blocks x 2 buffers
           + 2 * c2b * 4                 # bias
           + 2 * H * W * c2b * ob        # out blocks
           + H * W * c2b * 4             # f32 accumulator scratch
           + H * (W + 4) * cb * 2        # width-pass pad scratch
           + 8 * H * W * cb * 2)         # pooling temporaries headroom

    return pl.pallas_call(
        functools.partial(_spp_pool_cv2_kernel, H=H, W=W),
        out_shape=jax.ShapeDtypeStruct((N, H * W, c2), out_dtype),
        grid=(N, n_j, n_cb),
        in_specs=[y_spec, w_spec, w_spec, w_spec, w_spec, b_spec],
        out_specs=out_spec,
        scratch_shapes=[
            pltpu.VMEM((H, W + 4, cb), jnp.bfloat16),   # width-pass pad buffer
            pltpu.VMEM((H * W, c2b), jnp.float32),      # cv2 accumulator
        ],
        compiler_params=pltpu.CompilerParams(
            dimension_semantics=("parallel", "parallel", "arbitrary"),
            vmem_limit_bytes=_vmem_limit(est),
        ),
    )(y_nhwc, *w2_splits_bf16, bias2.reshape(1, c2))


# -----------------------------------------------------------------------------
# SPP module: params + forward
# -----------------------------------------------------------------------------
def _fold_bn(w, gamma, beta, mean, var, eps=1e-5):
    """Fold eval-mode BatchNorm into the 1x1-conv weight (scale) and a bias."""
    scale = gamma / jnp.sqrt(var + eps)
    w_eff = (w * scale[None, :]).astype(jnp.bfloat16)
    bias = (beta - mean * scale).astype(jnp.float32)
    return w_eff, bias


def init_spp_params(key, c1, c2, k=(5, 9, 13)):
    assert tuple(k) == (5, 9, 13), "fused kernel implements the standard (5,9,13) SPP"
    c_ = c1 // 2
    k1, k2 = jax.random.split(key)
    # PyTorch Conv2d weight is (Cout, Cin, 1, 1); stored here as (Cin, Cout).
    w1 = jax.random.normal(k1, (c1, c_), jnp.float32) * 0.1
    w2 = jax.random.normal(k2, (c_ * (len(k) + 1), c2), jnp.float32) * 0.1
    ones, zeros = jnp.ones, jnp.zeros
    # BatchNorm2d eval defaults: gamma=1, beta=0, running_mean=0, running_var=1
    w1_eff, b1 = _fold_bn(w1, ones((c_,)), zeros((c_,)), zeros((c_,)), ones((c_,)))
    w2_eff, b2 = _fold_bn(w2, ones((c2,)), zeros((c2,)), zeros((c2,)), ones((c2,)))
    # Split cv2's weight into the [y, p5, p9, p13] channel groups -> no concat.
    w2_splits = tuple(w2_eff[i * c_:(i + 1) * c_] for i in range(4))
    return dict(w1=w1_eff, b1=b1, w2_splits=w2_splits, b2=b2,
                c_=c_, k=tuple(k))


def spp_forward(params, x_nchw, out_dtype=jnp.bfloat16):
    N, C1, H, W = x_nchw.shape
    c_ = params["c_"]
    # TODO(synk): fold this NCHW->NHWC transpose (and the final one back) into the
    # kernels' BlockSpecs to save two full HBM passes over the activations.
    x2 = jnp.transpose(x_nchw, (0, 2, 3, 1)).reshape(N * H * W, C1).astype(jnp.bfloat16)
    y = conv1x1_bias_silu(x2, params["w1"], params["b1"],
                          out_dtype=jnp.bfloat16).reshape(N, H, W, c_)
    out = spp_pool_cv2(y, params["w2_splits"], params["b2"],
                       out_dtype=out_dtype)                    # (N, H*W, c2) bf16
    c2 = out.shape[-1]
    return jnp.transpose(out.reshape(N, H, W, c2), (0, 3, 1, 2))  # NHWC -> NCHW


# Pure-JAX reference (mirrors the kernel's bf16-matmul / f32-accumulate precision)
def spp_reference(params, x_nchw):
    x = jnp.transpose(x_nchw, (0, 2, 3, 1)).astype(jnp.float32)

    def cbs(z, w_bf16, b):
        zz = jnp.einsum("nhwc,cd->nhwd", z.astype(jnp.bfloat16), w_bf16,
                        preferred_element_type=jnp.float32) + b
        return zz * jax.nn.sigmoid(zz)

    y = cbs(x, params["w1"], params["b1"]).astype(jnp.bfloat16)
    yf = y.astype(jnp.float32)
    pools = []
    for kk in params["k"]:
        p = kk // 2
        pools.append(lax.reduce_window(
            yf, -jnp.inf, lax.max,
            window_dimensions=(1, kk, kk, 1),
            window_strides=(1, 1, 1, 1),
            padding=((0, 0), (p, p), (p, p), (0, 0))))
    cat = jnp.concatenate([yf] + pools, axis=-1)
    w2 = jnp.concatenate(params["w2_splits"], axis=0)
    out = cbs(cat, w2, params["b2"])
    return jnp.transpose(out, (0, 3, 1, 2))


if __name__ == "__main__":
    key = jax.random.PRNGKey(0)
    kx, kp = jax.random.split(key)

    N, C1, C2, H, W = 2, 4, 8, 16, 16
    x = jax.random.normal(kx, (N, C1, H, W), jnp.float32)        # NCHW input
    params = init_spp_params(kp, C1, C2, k=(5, 9, 13))

    out = jax.block_until_ready(spp_forward(params, x))
    ref = jax.block_until_ready(spp_reference(params, x))

    np.testing.assert_allclose(np.asarray(out.astype(jnp.float32)),
                               np.asarray(ref), rtol=2e-2, atol=2e-2)
    assert out.shape == (N, C2, H, W)
    print("KERNEL_OK")
</pallas_src>

<mosaic_0001>
module attributes {stable_mosaic.version = 11 : i64} {
  func.func @_conv1x1_bias_silu_kernel(%arg0: i32, %arg1: memref<512x4xbf16, #tpu.memory_space<vmem>>, %arg2: memref<4x2xbf16, #tpu.memory_space<vmem>>, %arg3: memref<1x2xf32, #tpu.memory_space<vmem>>, %arg4: memref<512x2xbf16, #tpu.memory_space<vmem>>) attributes {dimension_semantics = [#tpu.dimension_semantics<parallel>], iteration_bounds = array<i64: 1>, scalar_prefetch = 0 : i64, scratch_operands = 0 : i64, tpu.core_type = #tpu.core_type<tc>, window_params = [{transform_indices = @transform_0, window_bounds = array<i64: 512, 4>}, {pipeline_mode = #tpu.pipeline_mode<synchronous>, transform_indices = @transform_1, window_bounds = array<i64: 4, 2>}, {pipeline_mode = #tpu.pipeline_mode<synchronous>, transform_indices = @transform_2, window_bounds = array<i64: 1, 2>}, {transform_indices = @transform_3, window_bounds = array<i64: 512, 2>}]} {
    %c0 = arith.constant 0 : index
    %c0_0 = arith.constant 0 : index
    %0 = vector.load %arg1[%c0, %c0_0] : memref<512x4xbf16, #tpu.memory_space<vmem>>, vector<512x4xbf16>
    %c0_1 = arith.constant 0 : index
    %c0_2 = arith.constant 0 : index
    %1 = vector.load %arg2[%c0_1, %c0_2] : memref<4x2xbf16, #tpu.memory_space<vmem>>, vector<4x2xbf16>
    %cst = arith.constant dense<0.000000e+00> : vector<512x2xf32>
    %2 = tpu.matmul %0, %1, %cst {dimension_numbers = #tpu.dot_dimension_numbers<[1], [0], [0], [1], [0, 0, 1, 1], [], []>} : vector<512x4xbf16>, vector<4x2xbf16>, vector<512x2xf32> -> vector<512x2xf32>
    %c0_3 = arith.constant 0 : index
    %c0_4 = arith.constant 0 : index
    %3 = vector.load %arg3[%c0_3, %c0_4] : memref<1x2xf32, #tpu.memory_space<vmem>>, vector<1x2xf32>
    %4 = vector.broadcast %3 : vector<1x2xf32> to vector<512x2xf32>
    %5 = arith.addf %2, %4 : vector<512x2xf32>
    %6 = arith.negf %5 : vector<512x2xf32>
    %7 = math.exp %6 : vector<512x2xf32>
    %cst_5 = arith.constant 1.000000e+00 : f32
    %8 = vector.broadcast %cst_5 : f32 to vector<512x2xf32>
    %9 = arith.addf %8, %7 : vector<512x2xf32>
    %10 = arith.divf %8, %9 : vector<512x2xf32>
    %11 = arith.mulf %5, %10 : vector<512x2xf32>
    %12 = arith.truncf %11 : vector<512x2xf32> to vector<512x2xbf16>
    %c0_6 = arith.constant 0 : index
    %c0_7 = arith.constant 0 : index
    %13 = vector.load %arg4[%c0_6, %c0_7] : memref<512x2xbf16, #tpu.memory_space<vmem>>, vector<512x2xbf16>
    tpu.vector_store %arg4[%c0_6, %c0_7], %12 {strides = array<i32>} : memref<512x2xbf16, #tpu.memory_space<vmem>>, vector<512x2xbf16>,
    return
  }
  func.func @transform_0(%arg0: i32) -> (i32, i32) {
    %c0_i32 = arith.constant 0 : i32
    %c0_i32_0 = arith.constant 0 : i32
    return %arg0, %c0_i32 : i32, i32
  }
  func.func @transform_1(%arg0: i32) -> (i32, i32) {
    %c0_i32 = arith.constant 0 : i32
    %c0_i32_0 = arith.constant 0 : i32
    %c0_i32_1 = arith.constant 0 : i32
    return %c0_i32, %c0_i32_0 : i32, i32
  }
  func.func @transform_2(%arg0: i32) -> (i32, i32) {
    %c0_i32 = arith.constant 0 : i32
    %c0_i32_0 = arith.constant 0 : i32
    %c0_i32_1 = arith.constant 0 : i32
    return %c0_i32, %c0_i32_0 : i32, i32
  }
  func.func @transform_3(%arg0: i32) -> (i32, i32) {
    %c0_i32 = arith.constant 0 : i32
    %c0_i32_0 = arith.constant 0 : i32
    return %arg0, %c0_i32 : i32, i32
  }
}

</mosaic_0001>

<bundles_post_ra>
// kernel: tpu_custom_call.1
= control target key start
LH: loop header
LB: loop body
LE: loop exit
PB: predicated region body
PF: predicated region fallthrough
CT: control target
= control target key end

     0   :  { %vm344_vm0 = vcmask 1041408   ;;  %vm247_vm1 = vcmask 31744   ;;  %vm1341_vm2 = vcmask 11264   ;;  %s2905_s1 = inlined_call_operand.vmem [shape: bf16[4,2], index: 1, kind: input, shape index: {}]   ;;  %s2906_s0 = inlined_call_operand.vmem [shape: bf16[512,4], index: 0, kind: input, shape index: {}]   ;;  %s2907_s2 = inlined_call_operand.vmem [shape: f32[1,2], index: 2, kind: input, shape index: {}]   ;;  %s2908_s3 = inlined_call_operand.vmem [shape: bf16[512,2], index: 3, kind: output, shape index: {}]  }
   0x1   :  { %v79_v0 = vld [vmem:[%s2905_s1] sm:$0x3]  ;;  %v1772_v4 = vld [vmem:[%s2906_s0 + $0x8] sm:$0xff]   ;;  %v1774_v6 = vld [vmem:[%s2906_s0 + $0x10] sm:$0xff]  }
   0x2   :  { %1768 = vmatprep.subr.msk.bf16.mxu0 %vm344_vm0, %v79_v0  ;;  %1769 = vmatprep.subr.msk.bf16.mxu1 %vm344_vm0, %v79_v0  ;;  %v346_v1 = vsel %vm344_vm0, %v79_v0, 0  ;;  %v1770_v2 = vld [vmem:[%s2906_s0] sm:$0xff]   ;;  %v1773_v5 = vld [vmem:[%s2906_s0 + $0x88] sm:$0xff]   ;;  %v1775_v7 = vld [vmem:[%s2906_s0 + $0x90] sm:$0xff]  }
   0x3   :  { %1701 = vmatpush3.bf16.msra.mxu0 %v346_v1  ;;  %1767 = vmatpush3.bf16.msra.mxu1 %v346_v1  ;;  %v1771_v3 = vld [vmem:[%s2906_s0 + $0x80] sm:$0xff]   ;;  %v1776_v8 = vld [vmem:[%s2906_s0 + $0x18] sm:$0xff]   ;;  %v1780_v12 = vld [vmem:[%s2906_s0 + $0x28] sm:$0xff]  }
   0x4   :  { %1702 = vmatprep.mubr.msk.bf16.mxu0 %vm247_vm1, %v1770_v2  ;;  %1734 = vmatprep.mubr.msk.bf16.mxu1 %vm247_vm1, %v1771_v3  ;;  %v1777_v9 = vld [vmem:[%s2906_s0 + $0x98] sm:$0xff]   ;;  %v1778_v10 = vld [vmem:[%s2906_s0 + $0x20] sm:$0xff]   ;;  %v1781_v13 = vld [vmem:[%s2906_s0 + $0xa8] sm:$0xff]  }
   0x5   :  { %v1779_v11 = vld [vmem:[%s2906_s0 + $0xa0] sm:$0xff]   ;;  %v1782_v14 = vld [vmem:[%s2906_s0 + $0x30] sm:$0xff]   ;;  %v1784_v16 = vld [vmem:[%s2906_s0 + $0x38] sm:$0xff]  }
   0x6   :  { %1703 = vmatmul.mubr.msk.bf16.vlgmr.msra.gmra.mrb[0].mxu0 %vm247_vm1, %v1772_v4  ;;  %1735 = vmatmul.mubr.msk.bf16.vlgmr.msra.gmra.mrb[0].mxu1 %vm247_vm1, %v1773_v5  ;;  %v1783_v15 = vld [vmem:[%s2906_s0 + $0xb0] sm:$0xff]   ;;  %v1785_v17 = vld [vmem:[%s2906_s0 + $0xb8] sm:$0xff]   ;;  %v1786_v18 = vld [vmem:[%s2906_s0 + $0x40] sm:$0xff]  }
   0x7   :  { %1706 = vmatprep.mubr.msk.bf16.mxu0 %vm247_vm1, %v1774_v6  ;;  %1738 = vmatprep.mubr.msk.bf16.mxu1 %vm247_vm1, %v1775_v7  ;;  %v1787_v19 = vld [vmem:[%s2906_s0 + $0xc0] sm:$0xff]   ;;  %v1788_v20 = vld [vmem:[%s2906_s0 + $0x48] sm:$0xff]   ;;  %v1790_v22 = vld [vmem:[%s2906_s0 + $0x50] sm:$0xff]  }
   0x8   :  { %v1789_v21 = vld [vmem:[%s2906_s0 + $0xc8] sm:$0xff]   ;;  %v1791_v23 = vld [vmem:[%s2906_s0 + $0xd0] sm:$0xff]   ;;  %v1792_v24 = vld [vmem:[%s2906_s0 + $0x58] sm:$0xff]  }
   0x9   :  { %v1793_v25 = vld [vmem:[%s2906_s0 + $0xd8] sm:$0xff]   ;;  %v1794_v26 = vld [vmem:[%s2906_s0 + $0x60] sm:$0xff]   ;;  %v1796_v28 = vld [vmem:[%s2906_s0 + $0x68] sm:$0xff]  }
   0xa   :  { %v1795_v27 = vld [vmem:[%s2906_s0 + $0xe0] sm:$0xff]   ;;  %v1797_v29 = vld [vmem:[%s2906_s0 + $0xe8] sm:$0xff]   ;;  %v1798_v30 = vld [vmem:[%s2906_s0 + $0x70] sm:$0xff]  }
   0xb   :  { %v1799_v31 = vld [vmem:[%s2906_s0 + $0xf0] sm:$0xff]   ;;  %v1800_v32 = vld [vmem:[%s2906_s0 + $0x78] sm:$0xff]   ;;  %v2213_v34 = vld [vmem:[%s2907_s2] ss:$0 sm:$0xff] }
   0xc   :  { %v1801_v33 = vld [vmem:[%s2906_s0 + $0xf8] sm:$0xff]  }
   0xe   :  { %1707 = vmatmul.mubr.msk.bf16.gmra.mrb[4].mxu0 %vm247_vm1, %v1776_v8  ;;  %1739 = vmatmul.mubr.msk.bf16.gmra.mrb[4].mxu1 %vm247_vm1, %v1777_v9 }
   0xf   :  { %1710 = vmatprep.mubr.msk.bf16.mxu0 %vm247_vm1, %v1778_v10  ;;  %1742 = vmatprep.mubr.msk.bf16.mxu1 %vm247_vm1, %v1779_v11 }
  0x16   :  { %1711 = vmatmul.mubr.msk.bf16.gmra.mrb[8].mxu0 %vm247_vm1, %v1780_v12  ;;  %1743 = vmatmul.mubr.msk.bf16.gmra.mrb[8].mxu1 %vm247_vm1, %v1781_v13 }
  0x17   :  { %1714 = vmatprep.mubr.msk.bf16.mxu0 %vm247_vm1, %v1782_v14  ;;  %1746 = vmatprep.mubr.msk.bf16.mxu1 %vm247_vm1, %v1783_v15 }
  0x1e   :  { %1715 = vmatmul.mubr.msk.bf16.gmra.mrb[12].mxu0 %vm247_vm1, %v1784_v16  ;;  %1747 = vmatmul.mubr.msk.bf16.gmra.mrb[12].mxu1 %vm247_vm1, %v1785_v17 }
  0x1f   :  { %1718 = vmatprep.mubr.msk.bf16.mxu0 %vm247_vm1, %v1786_v18  ;;  %1750 = vmatprep.mubr.msk.bf16.mxu1 %vm247_vm1, %v1787_v19 }
  0x26   :  { %1719 = vmatmul.mubr.msk.bf16.gmra.mrb[16].mxu0 %vm247_vm1, %v1788_v20  ;;  %1751 = vmatmul.mubr.msk.bf16.gmra.mrb[16].mxu1 %vm247_vm1, %v1789_v21 }
  0x27   :  { %1722 = vmatprep.mubr.msk.bf16.mxu0 %vm247_vm1, %v1790_v22  ;;  %1754 = vmatprep.mubr.msk.bf16.mxu1 %vm247_vm1, %v1791_v23 }
  0x2e   :  { %1723 = vmatmul.mubr.msk.bf16.gmra.mrb[20].mxu0 %vm247_vm1, %v1792_v24  ;;  %1755 = vmatmul.mubr.msk.bf16.gmra.mrb[20].mxu1 %vm247_vm1, %v1793_v25 }
  0x2f   :  { %1726 = vmatprep.mubr.msk.bf16.mxu0 %vm247_vm1, %v1794_v26  ;;  %1758 = vmatprep.mubr.msk.bf16.mxu1 %vm247_vm1, %v1795_v27 }
  0x36   :  { %1727 = vmatmul.mubr.msk.bf16.gmra.mrb[24].mxu0 %vm247_vm1, %v1796_v28  ;;  %1759 = vmatmul.mubr.msk.bf16.gmra.mrb[24].mxu1 %vm247_vm1, %v1797_v29 }
  0x37   :  { %1730 = vmatprep.mubr.msk.bf16.mxu0 %vm247_vm1, %v1798_v30  ;;  %1762 = vmatprep.mubr.msk.bf16.mxu1 %vm247_vm1, %v1799_v31 }
  0x3e   :  { %1731 = vmatmul.mubr.msk.bf16.gmra.mrb[28].mxu0 %vm247_vm1, %v1800_v32  ;;  %1763 = vmatmul.mubr.msk.bf16.gmra.mrb[28].mxu1 %vm247_vm1, %v1801_v33 }
  0xd9   :  { %v1704_v35 = vpop.f32.mrb[0].mxu0  ;;  %v1736_v37 = vpop.f32.mrb[0].mxu1 }
  0xda   :  { %v2216_v36 = vadd.f32 %v1704_v35, %v2213_v34  ;;  %v382_v38 = vpop.f32.mrb[1].mxu0  ;;  %v2219_v39 = vadd.f32 %v1736_v37, %v2213_v34  ;;  %v510_v41 = vpop.f32.mrb[1].mxu1 }
  0xdb   :  { %v2222_v40 = vadd.f32 %v2213_v34, %v382_v38  ;;  %v1705_v42 = vpop.f32.mrb[2].mxu0  ;;  %v2226_v44 = vadd.f32 %v2213_v34, %v510_v41  ;;  %v1737_v46 = vpop.f32.mrb[2].mxu1 }
  0xdc   :  { %v1477_v43 = vmul.f32 -1.442695, %v2216_v36  ;;  %v2229_v45 = vadd.f32 %v1705_v42, %v2213_v34  ;;  %v385_v47 = vpop.f32.mrb[3].mxu0  ;;  %v1509_v48 = vmul.f32 -1.442695, %v2219_v39  ;;  %v2234_v50 = vadd.f32 %v1737_v46, %v2213_v34  ;;  %v513_v52 = vpop.f32.mrb[3].mxu1 }
  0xdd   :  { %v1475_v49 = vmul.f32 -1.442695, %v2222_v40  ;;  %v2237_v51 = vadd.f32 %v2213_v34, %v385_v47  ;;  %v1507_v53 = vmul.f32 -1.442695, %v2226_v44  ;;  %v2242_v55 = vadd.f32 %v2213_v34, %v513_v52 }
  0xde   :  { %1802 = vpow2.f32 %v1477_v43  ;;  %v1478_v54 = vmul.f32 -1.442695, %v2229_v45  ;;  %v1510_v56 = vmul.f32 -1.442695, %v2234_v50 }
  0xdf   :  { %1804 = vpow2.f32 %v1509_v48  ;;  %v1476_v57 = vmul.f32 -1.442695, %v2237_v51  ;;  %v1508_v58 = vmul.f32 -1.442695, %v2242_v55 }
  0xe0   :  { %1806 = vpow2.f32 %v1475_v49 }
  0xe1   :  { %1808 = vpow2.f32 %v1507_v53  ;;  %v1708_v59 = vpop.f32.mrb[4].mxu0  ;;  %v1740_v61 = vpop.f32.mrb[4].mxu1 }
  0xe2   :  { %1810 = vpow2.f32 %v1478_v54  ;;  %v2248_v60 = vadd.f32 %v1708_v59, %v2213_v34  ;;  %v398_v62 = vpop.f32.mrb[5].mxu0  ;;  %v2251_v63 = vadd.f32 %v1740_v61, %v2213_v34  ;;  %v526_v1 = vpop.f32.mrb[5].mxu1 }
  0xe3   :  { %1812 = vpow2.f32 %v1510_v56  ;;  %v2254_v0 = vadd.f32 %v2213_v34, %v398_v62  ;;  %v1709_v2 = vpop.f32.mrb[6].mxu0  ;;  %v2258_v4 = vadd.f32 %v2213_v34, %v526_v1  ;;  %v1741_v6 = vpop.f32.mrb[6].mxu1 }
  0xe4   :  { %1814 = vpow2.f32 %v1476_v57  ;;  %v1481_v3 = vmul.f32 -1.442695, %v2248_v60  ;;  %v2261_v5 = vadd.f32 %v1709_v2, %v2213_v34  ;;  %v401_v7 = vpop.f32.mrb[7].mxu0  ;;  %v1513_v8 = vmul.f32 -1.442695, %v2251_v63  ;;  %v529_v10 = vpop.f32.mrb[7].mxu1 }
  0xe5   :  { %1816 = vpow2.f32 %v1508_v58  ;;  %v1479_v9 = vmul.f32 -1.442695, %v2254_v0  ;;  %v1511_v11 = vmul.f32 -1.442695, %v2258_v4  ;;  %v2270_v35 = vadd.f32 %v1741_v6, %v2213_v34 }
  0xe6   :  { %1818 = vpow2.f32 %v1481_v3  ;;  %v1482_v12 = vmul.f32 -1.442695, %v2261_v5  ;;  %v2273_v41 = vadd.f32 %v2213_v34, %v401_v7  ;;  %v2276_v46 = vadd.f32 %v2213_v34, %v529_v10 }
  0xe7   :  { %1820 = vpow2.f32 %v1513_v8  ;;  %v1514_v57 = vmul.f32 -1.442695, %v2270_v35 }
  0xe8   :  { %v1803_v13 = vpop.eup %1802  ;;  %1822 = vpow2.f32 %v1479_v9  ;;  %v1480_v2 = vmul.f32 -1.442695, %v2273_v41  ;;  %v1512_v10 = vmul.f32 -1.442695, %v2276_v46 }
  0xe9   :  { %v1805_v14 = vpop.eup %1804  ;;  %v831_v15 = vadd.f32 1.0, %v1803_v13  ;;  %1824 = vpow2.f32 %v1511_v11  ;;  %v1712_v16 = vpop.f32.mrb[8].mxu0 }
  0xea   :  { %v1807_v17 = vpop.eup %1806  ;;  %v863_v18 = vadd.f32 1.0, %v1805_v14  ;;  %1826 = vpow2.f32 %v1482_v12  ;;  %v1744_v19 = vpop.f32.mrb[8].mxu1  ;;  %v2279_v49 = vadd.f32 %v1712_v16, %v2213_v34 }
  0xeb   :  { %v414_v20 = vpop.f32.mrb[9].mxu0  ;;  %v1809_v21 = vpop.eup %1808  ;;  %1828 = vrcp.f32 %v831_v15  ;;  %v829_v22 = vadd.f32 1.0, %v1807_v17  ;;  %v2282_v52 = vadd.f32 %v1744_v19, %v2213_v34 }
  0xec   :  { %v542_v23 = vpop.f32.mrb[9].mxu1  ;;  %v1713_v24 = vpop.f32.mrb[10].mxu0  ;;  %1830 = vrcp.f32 %v863_v18  ;;  %v861_v26 = vadd.f32 1.0, %v1809_v21  ;;  %v2288_v58 = vadd.f32 %v2213_v34, %v414_v20  ;;  %v1485_v16 = vmul.f32 -1.442695, %v2279_v49 }
  0xed   :  { %v1811_v25 = vpop.eup %1810  ;;  %v1745_v27 = vpop.f32.mrb[10].mxu1  ;;  %1832 = vrcp.f32 %v829_v22  ;;  %v2296_v3 = vadd.f32 %v2213_v34, %v542_v23  ;;  %v2304_v11 = vadd.f32 %v1713_v24, %v2213_v34  ;;  %v1517_v17 = vmul.f32 -1.442695, %v2282_v52 }
  0xee   :  { %v417_v28 = vpop.f32.mrb[11].mxu0  ;;  %v1813_v29 = vpop.eup %1812  ;;  %v832_v30 = vadd.f32 1.0, %v1811_v25  ;;  %1834 = vrcp.f32 %v861_v26  ;;  %v1483_v21 = vmul.f32 -1.442695, %v2288_v58  ;;  %v2317_v22 = vadd.f32 %v1745_v27, %v2213_v34 }
  0xef   :  { %v2267_v31 = vpop.f32.mrb[11].mxu1  ;;  %v1815_v32 = vpop.eup %1814  ;;  %v864_v33 = vadd.f32 1.0, %v1813_v29  ;;  %v1515_v25 = vmul.f32 -1.442695, %v2296_v3  ;;  %v2322_v26 = vadd.f32 %v2213_v34, %v417_v28 }
  0xf0   :  { %v1817_v37 = vpop.eup %1816  ;;  %1836 = vrcp.f32 %v832_v30  ;;  %v830_v38 = vadd.f32 1.0, %v1815_v32 }
  0xf1   :  { %v1819_v42 = vpop.eup %1818  ;;  %1838 = vrcp.f32 %v864_v33  ;;  %v862_v43 = vadd.f32 1.0, %v1817_v37  ;;  %v2284_v53 = vpop.f32.mrb[12].mxu0 }
  0xf2   :  { %v1821_v47 = vpop.eup %1820  ;;  %1840 = vrcp.f32 %v830_v38  ;;  %v835_v48 = vadd.f32 1.0, %v1819_v42  ;;  %v2290_v59 = vpop.f32.mrb[12].mxu1 }
  0xf3   :  { %v1823_v54 = vpop.eup %1822  ;;  %1842 = vrcp.f32 %v862_v43  ;;  %v867_v56 = vadd.f32 1.0, %v1821_v47  ;;  %v2292_v61 = vpop.f32.mrb[13].mxu0  ;;  %v1518_v43 = vmul.f32 -1.442695, %v2317_v22 }
  0xf4   :  { %v1825_v62 = vpop.eup %1824  ;;  %1844 = vrcp.f32 %v835_v48  ;;  %v833_v1 = vadd.f32 1.0, %v1823_v54  ;;  %v2298_v6 = vpop.f32.mrb[13].mxu1 }
  0xf5   :  { %v2300_v7 = vpop.f32.mrb[14].mxu0  ;;  %v1827_v8 = vpop.eup %1826  ;;  %1846 = vrcp.f32 %v867_v56  ;;  %v865_v9 = vadd.f32 1.0, %v1825_v62 }
  0xf6   :  { %v2306_v12 = vpop.f32.mrb[14].mxu1  ;;  %v2308_v13 = vpop.f32.mrb[15].mxu0  ;;  %1848 = vrcp.f32 %v833_v1  ;;  %v836_v15 = vadd.f32 1.0, %v1827_v8 }
  0xf7   :  { %v1829_v14 = vpop.eup %1828  ;;  %v2312_v18 = vpop.f32.mrb[15].mxu1  ;;  %1850 = vrcp.f32 %v865_v9 }
  0xf8   :  { %v1831_v19 = vpop.eup %1830  ;;  %v1023_v20 = vmul.f32 %v1829_v14, %v2216_v36  ;;  %1852 = vrcp.f32 %v836_v15  ;;  %v1486_v36 = vmul.f32 -1.442695, %v2304_v11 }
  0xf9   :  { %v1833_v23 = vpop.eup %1832  ;;  %v1055_v24 = vmul.f32 %v1831_v19, %v2219_v39  ;;  %1854 = vpow2.f32 %v1514_v57  ;;  %v2329_v39 = vadd.f32 %v2213_v34, %v2267_v31  ;;  %v2331_v38 = vpop.f32.mrb[16].mxu0 }
  0xfa   :  { %v1835_v29 = vpop.eup %1834  ;;  %v1605_v30 = vpack.c.bf16 %v1023_v20, %v1023_v20  ;;  %v1021_v32 = vmul.f32 %v1833_v23, %v2222_v40  ;;  %1856 = vpow2.f32 %v1480_v2  ;;  %v2341_v47 = vpop.f32.mrb[17].mxu0 }
  0xfb   :  { %v1837_v33 = vpop.eup %1836  ;;  %v1637_v37 = vpack.c.bf16 %v1055_v24, %v1055_v24  ;;  %v1053_v27 = vmul.f32 %v1835_v29, %v2226_v44  ;;  %1858 = vpow2.f32 %v1512_v10  ;;  %v2339_v44 = vpop.f32.mrb[16].mxu1  ;;  %v1516_v19 = vmul.f32 -1.442695, %v2329_v39 }
  0xfc   :  { %v1839_v28 = vpop.eup %1838  ;;  %1344 = vst.msk [vmem:[%s2908_s3 + $0x8] sm:$0xf] %vm1341_vm2, %v1605_v30  ;;  %v1603_v40 = vpack.c.bf16 %v1021_v32, %v1021_v32  ;;  %v1024_v42 = vmul.f32 %v1837_v33, %v2229_v45  ;;  %1860 = vpow2.f32 %v1485_v16  ;;  %v2350_v45 = vadd.f32 %v2284_v53, %v2213_v34  ;;  %v2352_v56 = vpop.f32.mrb[17].mxu1 }
  0xfd   :  { %v1841_v31 = vpop.eup %1840  ;;  %1376 = vst.msk [vmem:[%s2908_s3 + $0x88] sm:$0xf] %vm1341_vm2, %v1637_v37  ;;  %v1635_v48 = vpack.c.bf16 %v1053_v27, %v1053_v27  ;;  %v1056_v54 = vmul.f32 %v1839_v28, %v2234_v50  ;;  %v2354_v57 = vpop.f32.mrb[18].mxu0  ;;  %1862 = vpow2.f32 %v1517_v17  ;;  %v2363_v50 = vadd.f32 %v2290_v59, %v2213_v34 }
  0xfe   :  { %v1843_v62 = vpop.eup %1842  ;;  %1342 = vst.msk [vmem:[%s2908_s3] sm:$0xf] %vm1341_vm2, %v1603_v40  ;;  %v1606_v1 = vpack.c.bf16 %v1024_v42, %v1024_v42  ;;  %v1022_v2 = vmul.f32 %v1841_v31, %v2237_v51  ;;  %v2365_v53 = vpop.f32.mrb[18].mxu1  ;;  %1864 = vpow2.f32 %v1483_v21  ;;  %v1484_v51 = vmul.f32 -1.442695, %v2322_v26 }
  0xff   :  { %v2367_v8 = vpop.f32.mrb[19].mxu0  ;;  %v1845_v9 = vpop.eup %1844  ;;  %1374 = vst.msk [vmem:[%s2908_s3 + $0x80] sm:$0xf] %vm1341_vm2, %v1635_v48  ;;  %v1638_v10 = vpack.c.bf16 %v1056_v54, %v1056_v54  ;;  %v1054_v14 = vmul.f32 %v1843_v62, %v2242_v55  ;;  %1866 = vpow2.f32 %v1515_v25  ;;  %v1489_v23 = vmul.f32 -1.442695, %v2350_v45 }
 0x100   :  { %v2375_v15 = vpop.f32.mrb[19].mxu1  ;;  %v1847_v59 = vpop.eup %1846  ;;  %1345 = vst.msk [vmem:[%s2908_s3 + $0xc] sm:$0xf] %vm1341_vm2, %v1606_v1  ;;  %v1604_v16 = vpack.c.bf16 %v1022_v2, %v1022_v2  ;;  %v1027_v17 = vmul.f32 %v1845_v9, %v2248_v60  ;;  %1868 = vpow2.f32 %v1486_v36  ;;  %v1521_v29 = vmul.f32 -1.442695, %v2363_v50 }
 0x101   :  { %v1849_v20 = vpop.eup %1848  ;;  %1377 = vst.msk [vmem:[%s2908_s3 + $0x8c] sm:$0xf] %vm1341_vm2, %v1638_v10  ;;  %v1636_v55 = vpack.c.bf16 %v1054_v14, %v1054_v14  ;;  %v1059_v21 = vmul.f32 %v1847_v59, %v2251_v63  ;;  %1870 = vpow2.f32 %v1518_v43  ;;  %v2400_v36 = vpop.f32.mrb[20].mxu0  ;;  %v2439_v59 = vadd.f32 %v2213_v34, %v2292_v61 }
 0x102   :  { %v1851_v24 = vpop.eup %1850  ;;  %1343 = vst.msk [vmem:[%s2908_s3 + $0x4] sm:$0xf] %vm1341_vm2, %v1604_v16  ;;  %v1609_v60 = vpack.c.bf16 %v1027_v17, %v1027_v17  ;;  %v1025_v25 = vmul.f32 %v1849_v20, %v2254_v0  ;;  %1872 = vpow2.f32 %v1484_v51  ;;  %v2407_v27 = vpop.f32.mrb[20].mxu1  ;;  %v2446_v61 = vadd.f32 %v2213_v34, %v2298_v6 }
 0x103   :  { %v1853_v30 = vpop.eup %1852  ;;  %1375 = vst.msk [vmem:[%s2908_s3 + $0x84] sm:$0xf] %vm1341_vm2, %v1636_v55  ;;  %v1641_v63 = vpack.c.bf16 %v1059_v21, %v1059_v21  ;;  %v1057_v32 = vmul.f32 %v1851_v24, %v2258_v4  ;;  %1874 = vpow2.f32 %v1516_v19  ;;  %v2409_v28 = vpop.f32.mrb[21].mxu0 }
 0x104   :  { %v1855_v33 = vpop.eup %1854  ;;  %1348 = vst.msk [vmem:[%s2908_s3 + $0x18] sm:$0xf] %vm1341_vm2, %v1609_v60  ;;  %v1607_v0 = vpack.c.bf16 %v1025_v25, %v1025_v25  ;;  %v1028_v37 = vmul.f32 %v1853_v30, %v2261_v5  ;;  %1876 = vpow2.f32 %v1489_v23  ;;  %v2415_v43 = vpop.f32.mrb[21].mxu1  ;;  %v1487_v25 = vmul.f32 -1.442695, %v2439_v59 }
 0x105   :  { %v1857_v40 = vpop.eup %1856  ;;  %1380 = vst.msk [vmem:[%s2908_s3 + $0x98] sm:$0xf] %vm1341_vm2, %v1641_v63  ;;  %v1639_v4 = vpack.c.bf16 %v1057_v32, %v1057_v32  ;;  %v868_v42 = vadd.f32 1.0, %v1855_v33  ;;  %v2417_v31 = vpop.f32.mrb[22].mxu0  ;;  %1878 = vpow2.f32 %v1521_v29  ;;  %v2454_v33 = vadd.f32 %v2300_v7, %v2213_v34 }
 0x106   :  { %v1859_v48 = vpop.eup %1858  ;;  %1346 = vst.msk [vmem:[%s2908_s3 + $0x10] sm:$0xf] %vm1341_vm2, %v1607_v0  ;;  %v1610_v5 = vpack.c.bf16 %v1028_v37, %v1028_v37  ;;  %v834_v54 = vadd.f32 1.0, %v1857_v40  ;;  %v2423_v62 = vpop.f32.mrb[22].mxu1  ;;  %v2458_v0 = vadd.f32 %v2306_v12, %v2213_v34 }
 0x107   :  { %v2425_v1 = vpop.f32.mrb[23].mxu0  ;;  %v1861_v2 = vpop.eup %1860  ;;  %1378 = vst.msk [vmem:[%s2908_s3 + $0x90] sm:$0xf] %vm1341_vm2, %v1639_v4  ;;  %1880 = vrcp.f32 %v868_v42  ;;  %v866_v9 = vadd.f32 1.0, %v1859_v48  ;;  %v2466_v42 = vadd.f32 %v2213_v34, %v2308_v13  ;;  %v2470_v48 = vadd.f32 %v2213_v34, %v2312_v18 }
 0x108   :  { %v2431_v10 = vpop.f32.mrb[23].mxu1  ;;  %v1863_v14 = vpop.eup %1862  ;;  %1349 = vst.msk [vmem:[%s2908_s3 + $0x1c] sm:$0xf] %vm1341_vm2, %v1610_v5  ;;  %1882 = vrcp.f32 %v834_v54  ;;  %v839_v51 = vadd.f32 1.0, %v1861_v2  ;;  %v2478_v2 = vadd.f32 %v2331_v38, %v2213_v34  ;;  %v1490_v38 = vmul.f32 -1.442695, %v2454_v33 }
 0x109   :  { %v1865_v16 = vpop.eup %1864  ;;  %1884 = vrcp.f32 %v866_v9  ;;  %v871_v17 = vadd.f32 1.0, %v1863_v14  ;;  %v2441_v23 = vpop.f32.mrb[24].mxu0  ;;  %v2482_v9 = vadd.f32 %v2339_v44, %v2213_v34 }
 0x10a   :  { %v1867_v19 = vpop.eup %1866  ;;  %1886 = vrcp.f32 %v839_v51  ;;  %v837_v20 = vadd.f32 1.0, %v1865_v16  ;;  %v2448_v29 = vpop.f32.mrb[24].mxu1  ;;  %v1519_v51 = vmul.f32 -1.442695, %v2446_v61  ;;  %v2489_v16 = vadd.f32 %v2213_v34, %v2341_v47 }
 0x10b   :  { %v1869_v55 = vpop.eup %1868  ;;  %1888 = vrcp.f32 %v871_v17  ;;  %v869_v21 = vadd.f32 1.0, %v1867_v19  ;;  %v2450_v30 = vpop.f32.mrb[25].mxu0  ;;  %v1493_v47 = vmul.f32 -1.442695, %v2478_v2 }
 0x10c   :  { %v1871_v24 = vpop.eup %1870  ;;  %1890 = vrcp.f32 %v837_v20  ;;  %v840_v60 = vadd.f32 1.0, %v1869_v55  ;;  %v2460_v37 = vpop.f32.mrb[25].mxu1  ;;  %v1522_v20 = vmul.f32 -1.442695, %v2458_v0 }
 0x10d   :  { %v1873_v63 = vpop.eup %1872  ;;  %1892 = vrcp.f32 %v869_v21  ;;  %v872_v32 = vadd.f32 1.0, %v1871_v24  ;;  %v2462_v40 = vpop.f32.mrb[26].mxu0  ;;  %v1488_v21 = vmul.f32 -1.442695, %v2466_v42  ;;  %v1520_v24 = vmul.f32 -1.442695, %v2470_v48 }
 0x10e   :  { %v1875_v6 = vpop.eup %1874  ;;  %1894 = vrcp.f32 %v840_v60  ;;  %v838_v4 = vadd.f32 1.0, %v1873_v63  ;;  %v2472_v7 = vpop.f32.mrb[26].mxu1 }
 0x10f   :  { %v2474_v5 = vpop.f32.mrb[27].mxu0  ;;  %v1877_v12 = vpop.eup %1876  ;;  %1896 = vrcp.f32 %v872_v32  ;;  %v870_v54 = vadd.f32 1.0, %v1875_v6  ;;  %v1525_v32 = vmul.f32 -1.442695, %v2482_v9 }
 0x110   :  { %v2484_v13 = vpop.f32.mrb[27].mxu1  ;;  %v1879_v14 = vpop.eup %1878  ;;  %1898 = vrcp.f32 %v838_v4  ;;  %v843_v18 = vadd.f32 1.0, %v1877_v12 }
 0x111   :  { %v1881_v17 = vpop.eup %1880  ;;  %1900 = vrcp.f32 %v870_v54  ;;  %v875_v19 = vadd.f32 1.0, %v1879_v14  ;;  %v2499_v6 = vpop.f32.mrb[28].mxu0 }
 0x112   :  { %v1883_v44 = vpop.eup %1882  ;;  %v1060_v55 = vmul.f32 %v1881_v17, %v2270_v35  ;;  %1902 = vrcp.f32 %v843_v18  ;;  %2909 = vst [vmem:[#allocation2_spill] sm:$0xff] %v2499_v6  ;;  %v1491_v35 = vmul.f32 -1.442695, %v2489_v16  ;;  %v2503_v14 = vpop.f32.mrb[28].mxu1 }
 0x113   :  { %v1885_v60 = vpop.eup %1884  ;;  %v1026_v63 = vmul.f32 %v1883_v44, %v2273_v41  ;;  %1904 = vrcp.f32 %v875_v19  ;;  %v2505_v18 = vpop.f32.mrb[29].mxu0  ;;  %v2510_v44 = vadd.f32 %v2213_v34, %v2352_v56 }
 0x114   :  { %v1887_v4 = vpop.eup %1886  ;;  %v1642_v12 = vpack.c.bf16 %v1060_v55, %v1060_v55  ;;  %v1058_v54 = vmul.f32 %v1885_v60, %v2276_v46  ;;  %1906 = vpow2.f32 %v1487_v25  ;;  %v2512_v6 = vpop.f32.mrb[29].mxu1 }
 0x115   :  { %v1889_v17 = vpop.eup %1888  ;;  %v1608_v41 = vpack.c.bf16 %v1026_v63, %v1026_v63  ;;  %v1031_v19 = vmul.f32 %v1887_v4, %v2279_v49  ;;  %1908 = vpow2.f32 %v1519_v51  ;;  %v2514_v55 = vpop.f32.mrb[30].mxu0  ;;  %v2523_v49 = vadd.f32 %v2354_v57, %v2213_v34 }
 0x116   :  { %v1891_v46 = vpop.eup %1890  ;;  %1381 = vst.msk [vmem:[%s2908_s3 + $0x9c] sm:$0xf] %vm1341_vm2, %v1642_v12  ;;  %v1640_v25 = vpack.c.bf16 %v1058_v54, %v1058_v54  ;;  %v1063_v60 = vmul.f32 %v1889_v17, %v2282_v52  ;;  %1910 = vpow2.f32 %v1490_v38  ;;  %v2525_v56 = vpop.f32.mrb[30].mxu1  ;;  %v2536_v52 = vadd.f32 %v2365_v53, %v2213_v34 }
 0x117   :  { %v2527_v51 = vpop.f32.mrb[31].mxu0  ;;  %v1893_v63 = vpop.eup %1892  ;;  %1347 = vst.msk [vmem:[%s2908_s3 + $0x14] sm:$0xf] %vm1341_vm2, %v1608_v41  ;;  %v1613_v4 = vpack.c.bf16 %v1031_v19, %v1031_v19  ;;  %v1029_v12 = vmul.f32 %v1891_v46, %v2288_v58  ;;  %1912 = vpow2.f32 %v1522_v20  ;;  %v2547_v58 = vadd.f32 %v2213_v34, %v2367_v8 }
 0x118   :  { %v2538_v57 = vpop.f32.mrb[31].mxu1  ;;  %v1895_v38 = vpop.eup %1894  ;;  %1379 = vst.msk [vmem:[%s2908_s3 + $0x94] sm:$0xf] %vm1341_vm2, %v1640_v25  ;;  %v1645_v54 = vpack.c.bf16 %v1063_v60, %v1063_v60  ;;  %v1061_v17 = vmul.f32 %v1893_v63, %v2296_v3  ;;  %1914 = vpow2.f32 %v1488_v21  ;;  %v1523_v19 = vmul.f32 -1.442695, %v2510_v44 }
 0x119   :  { %v1897_v20 = vpop.eup %1896  ;;  %1352 = vst.msk [vmem:[%s2908_s3 + $0x28] sm:$0xf] %vm1341_vm2, %v1613_v4  ;;  %v1611_v53 = vpack.c.bf16 %v1029_v12, %v1029_v12  ;;  %v1032_v41 = vmul.f32 %v1895_v38, %v2304_v11  ;;  %1916 = vpow2.f32 %v1520_v24  ;;  %v1494_v21 = vmul.f32 -1.442695, %v2523_v49 }
 0x11a   :  { %v1899_v46 = vpop.eup %1898  ;;  %1384 = vst.msk [vmem:[%s2908_s3 + $0xa8] sm:$0xf] %vm1341_vm2, %v1645_v54  ;;  %v1643_v3 = vpack.c.bf16 %v1061_v17, %v1061_v17  ;;  %v1064_v8 = vmul.f32 %v1897_v20, %v2317_v22  ;;  %1918 = vpow2.f32 %v1493_v47  ;;  %v1526_v60 = vmul.f32 -1.442695, %v2536_v52 }
 0x11b   :  { %v1901_v25 = vpop.eup %1900  ;;  %1350 = vst.msk [vmem:[%s2908_s3 + $0x20] sm:$0xf] %vm1341_vm2, %v1611_v53  ;;  %v1614_v11 = vpack.c.bf16 %v1032_v41, %v1032_v41  ;;  %v1030_v24 = vmul.f32 %v1899_v46, %v2322_v26  ;;  %1920 = vpow2.f32 %v1525_v32  ;;  %v1492_v4 = vmul.f32 -1.442695, %v2547_v58 }
 0x11c   :  { %v1903_v63 = vpop.eup %1902  ;;  %1382 = vst.msk [vmem:[%s2908_s3 + $0xa0] sm:$0xf] %vm1341_vm2, %v1643_v3  ;;  %v1646_v22 = vpack.c.bf16 %v1064_v8, %v1064_v8  ;;  %v1062_v47 = vmul.f32 %v1901_v25, %v2329_v39  ;;  %1922 = vpow2.f32 %v1491_v35  ;;  %v2601_v25 = vadd.f32 %v2213_v34, %v2375_v15 }
 0x11d   :  { %v1905_v12 = vpop.eup %1904  ;;  %1353 = vst.msk [vmem:[%s2908_s3 + $0x2c] sm:$0xf] %vm1341_vm2, %v1614_v11  ;;  %v1612_v26 = vpack.c.bf16 %v1030_v24, %v1030_v24  ;;  %v1035_v32 = vmul.f32 %v1903_v63, %v2350_v45  ;;  %1924 = vpow2.f32 %v1523_v19 }
 0x11e   :  { %v1907_v38 = vpop.eup %1906  ;;  %1385 = vst.msk [vmem:[%s2908_s3 + $0xac] sm:$0xf] %vm1341_vm2, %v1646_v22  ;;  %v1644_v39 = vpack.c.bf16 %v1062_v47, %v1062_v47  ;;  %v1067_v35 = vmul.f32 %v1905_v12, %v2363_v50  ;;  %1926 = vpow2.f32 %v1494_v21  ;;  %v2609_v12 = vadd.f32 %v2407_v27, %v2213_v34 }
 0x11f   :  { %v1909_v54 = vpop.eup %1908  ;;  %1351 = vst.msk [vmem:[%s2908_s3 + $0x24] sm:$0xf] %vm1341_vm2, %v1612_v26  ;;  %v1617_v17 = vpack.c.bf16 %v1035_v32, %v1035_v32  ;;  %v841_v20 = vadd.f32 1.0, %v1907_v38  ;;  %1928 = vpow2.f32 %v1526_v60  ;;  %v1524_v32 = vmul.f32 -1.442695, %v2601_v25 }
 0x120   :  { %v1911_v45 = vpop.eup %1910  ;;  %1383 = vst.msk [vmem:[%s2908_s3 + $0xa4] sm:$0xf] %vm1341_vm2, %v1644_v39  ;;  %v1649_v53 = vpack.c.bf16 %v1067_v35, %v1067_v35  ;;  %v873_v41 = vadd.f32 1.0, %v1909_v54  ;;  %1930 = vpow2.f32 %v1492_v4  ;;  %v2605_v4 = vadd.f32 %v2400_v36, %v2213_v34 }
 0x121   :  { %v1913_v50 = vpop.eup %1912  ;;  %1356 = vst.msk [vmem:[%s2908_s3 + $0x38] sm:$0xf] %vm1341_vm2, %v1617_v17  ;;  %1932 = vrcp.f32 %v841_v20  ;;  %v844_v19 = vadd.f32 1.0, %v1911_v45  ;;  %v2614_v38 = vadd.f32 %v2213_v34, %v2409_v28  ;;  %v2618_v36 = vadd.f32 %v2213_v34, %v2415_v43 }
 0x122   :  { %v1915_v46 = vpop.eup %1914  ;;  %1388 = vst.msk [vmem:[%s2908_s3 + $0xb8] sm:$0xf] %vm1341_vm2, %v1649_v53  ;;  %1934 = vrcp.f32 %v873_v41  ;;  %v876_v3 = vadd.f32 1.0, %v1913_v50  ;;  %v2622_v27 = vadd.f32 %v2417_v31, %v2213_v34  ;;  %v2626_v20 = vadd.f32 %v2423_v62, %v2213_v34 }
 0x123   :  { %v1917_v8 = vpop.eup %1916  ;;  %1936 = vrcp.f32 %v844_v19  ;;  %v842_v21 = vadd.f32 1.0, %v1915_v46  ;;  %v2630_v28 = vadd.f32 %v2213_v34, %v2425_v1  ;;  %v1497_v43 = vmul.f32 -1.442695, %v2605_v4 }
 0x124   :  { %v1919_v11 = vpop.eup %1918  ;;  %1938 = vrcp.f32 %v876_v3  ;;  %v874_v24 = vadd.f32 1.0, %v1917_v8  ;;  %v1529_v41 = vmul.f32 -1.442695, %v2609_v12  ;;  %v1495_v19 = vmul.f32 -1.442695, %v2614_v38 }
 0x125   :  { %v1921_v60 = vpop.eup %1920  ;;  %1940 = vrcp.f32 %v842_v21  ;;  %v847_v63 = vadd.f32 1.0, %v1919_v11  ;;  %v2637_v62 = vadd.f32 %v2213_v34, %v2431_v10  ;;  %v1527_v3 = vmul.f32 -1.442695, %v2618_v36 }
 0x126   :  { %v1923_v22 = vpop.eup %1922  ;;  %1942 = vrcp.f32 %v874_v24  ;;  %v879_v47 = vadd.f32 1.0, %v1921_v60  ;;  %v1498_v8 = vmul.f32 -1.442695, %v2622_v27  ;;  %v1530_v24 = vmul.f32 -1.442695, %v2626_v20 }
 0x127   :  { %v1925_v26 = vpop.eup %1924  ;;  %1944 = vrcp.f32 %v847_v63  ;;  %v845_v15 = vadd.f32 1.0, %v1923_v22  ;;  %v1496_v60 = vmul.f32 -1.442695, %v2630_v28 }
 0x128   :  { %v1927_v39 = vpop.eup %1926  ;;  %1946 = vrcp.f32 %v879_v47  ;;  %v877_v35 = vadd.f32 1.0, %v1925_v26 }
 0x129   :  { %v1929_v54 = vpop.eup %1928  ;;  %1948 = vrcp.f32 %v845_v15  ;;  %v848_v17 = vadd.f32 1.0, %v1927_v39 }
 0x12a   :  { %v1931_v45 = vpop.eup %1930  ;;  %1950 = vrcp.f32 %v877_v35  ;;  %v880_v53 = vadd.f32 1.0, %v1929_v54 }
 0x12b   :  { %v1933_v31 = vpop.eup %1932  ;;  %1952 = vrcp.f32 %v848_v17  ;;  %v846_v50 = vadd.f32 1.0, %v1931_v45  ;;  %v2668_v17 = vadd.f32 %v2213_v34, %v2450_v30 }
 0x12c   :  { %v1935_v46 = vpop.eup %1934  ;;  %v1033_v1 = vmul.f32 %v1933_v31, %v2439_v59  ;;  %1954 = vrcp.f32 %v880_v53  ;;  %v2648_v59 = vadd.f32 %v2441_v23, %v2213_v34  ;;  %v2659_v23 = vadd.f32 %v2448_v29, %v2213_v34 }
 0x12d   :  { %v1937_v21 = vpop.eup %1936  ;;  %v1065_v11 = vmul.f32 %v1935_v46, %v2446_v61  ;;  %1956 = vrcp.f32 %v846_v50  ;;  %v1528_v61 = vmul.f32 -1.442695, %v2637_v62  ;;  %v2677_v53 = vadd.f32 %v2213_v34, %v2460_v37 }
 0x12e   :  { %v1939_v63 = vpop.eup %1938  ;;  %v1615_v22 = vpack.c.bf16 %v1033_v1, %v1033_v1  ;;  %v1036_v10 = vmul.f32 %v1937_v21, %v2454_v33  ;;  %1958 = vpow2.f32 %v1524_v32  ;;  %v1499_v46 = vmul.f32 -1.442695, %v2668_v17 }
 0x12f   :  { %v1941_v47 = vpop.eup %1940  ;;  %v1647_v26 = vpack.c.bf16 %v1065_v11, %v1065_v11  ;;  %v1068_v15 = vmul.f32 %v1939_v63, %v2458_v0  ;;  %1960 = vpow2.f32 %v1497_v43 }
 0x130   :  { %v1943_v39 = vpop.eup %1942  ;;  %1354 = vst.msk [vmem:[%s2908_s3 + $0x30] sm:$0xf] %vm1341_vm2, %v1615_v22  ;;  %v1618_v35 = vpack.c.bf16 %v1036_v10, %v1036_v10  ;;  %v1034_v33 = vmul.f32 %v1941_v47, %v2466_v42  ;;  %1962 = vpow2.f32 %v1529_v41  ;;  %v1501_v41 = vmul.f32 -1.442695, %v2648_v59 }
 0x131   :  { %v1945_v32 = vpop.eup %1944  ;;  %1386 = vst.msk [vmem:[%s2908_s3 + $0xb0] sm:$0xf] %vm1341_vm2, %v1647_v26  ;;  %v1650_v0 = vpack.c.bf16 %v1068_v15, %v1068_v15  ;;  %v1066_v54 = vmul.f32 %v1943_v39, %v2470_v48  ;;  %1964 = vpow2.f32 %v1495_v19 }
 0x132   :  { %v1947_v42 = vpop.eup %1946  ;;  %1357 = vst.msk [vmem:[%s2908_s3 + $0x3c] sm:$0xf] %vm1341_vm2, %v1618_v35  ;;  %v1616_v29 = vpack.c.bf16 %v1034_v33, %v1034_v33  ;;  %v1039_v45 = vmul.f32 %v1945_v32, %v2478_v2  ;;  %1966 = vpow2.f32 %v1527_v3  ;;  %v1533_v2 = vmul.f32 -1.442695, %v2659_v23 }
 0x133   :  { %v1949_v48 = vpop.eup %1948  ;;  %1389 = vst.msk [vmem:[%s2908_s3 + $0xbc] sm:$0xf] %vm1341_vm2, %v1650_v0  ;;  %v1648_v30 = vpack.c.bf16 %v1066_v54, %v1066_v54  ;;  %v1071_v43 = vmul.f32 %v1947_v42, %v2482_v9  ;;  %1968 = vpow2.f32 %v1498_v8  ;;  %v1531_v8 = vmul.f32 -1.442695, %v2677_v53 }
 0x134   :  { %v1951_v31 = vpop.eup %1950  ;;  %1355 = vst.msk [vmem:[%s2908_s3 + $0x34] sm:$0xf] %vm1341_vm2, %v1616_v29  ;;  %v1621_v34 = vpack.c.bf16 %v1039_v45, %v1039_v45  ;;  %v1037_v37 = vmul.f32 %v1949_v48, %v2489_v16  ;;  %1970 = vpow2.f32 %v1530_v24  ;;  %v2058_v48 = vld [vmem:[%s2907_s2] ss:$0 sm:$0xff] }
 0x135   :  { %v1953_v50 = vpop.eup %1952  ;;  %1387 = vst.msk [vmem:[%s2908_s3 + $0xb4] sm:$0xf] %vm1341_vm2, %v1648_v30  ;;  %v1653_v9 = vpack.c.bf16 %v1071_v43, %v1071_v43  ;;  %v1069_v19 = vmul.f32 %v1951_v31, %v2510_v44  ;;  %1972 = vpow2.f32 %v1496_v60  ;;  %v2733_v30 = vadd.f32 %v2058_v48, %v2462_v40 }
 0x136   :  { %v1955_v1 = vpop.eup %1954  ;;  %1360 = vst.msk [vmem:[%s2908_s3 + $0x48] sm:$0xf] %vm1341_vm2, %v1621_v34  ;;  %v1619_v16 = vpack.c.bf16 %v1037_v37, %v1037_v37  ;;  %v1040_v3 = vmul.f32 %v1953_v50, %v2523_v49  ;;  %1974 = vpow2.f32 %v1528_v61  ;;  %v2736_v43 = vadd.f32 %v2058_v48, %v2472_v7 }
 0x137   :  { %v1957_v21 = vpop.eup %1956  ;;  %1392 = vst.msk [vmem:[%s2908_s3 + $0xc8] sm:$0xf] %vm1341_vm2, %v1653_v9  ;;  %v1651_v44 = vpack.c.bf16 %v1069_v19, %v1069_v19  ;;  %v1072_v11 = vmul.f32 %v1955_v1, %v2536_v52  ;;  %1976 = vpow2.f32 %v1501_v41  ;;  %v2739_v34 = vadd.f32 %v2058_v48, %v2474_v5  ;;  %v2910_v9 = vld [vmem:[#allocation2_spill] sm:$0xff] }
 0x138   :  { %v1959_v24 = vpop.eup %1958  ;;  %1358 = vst.msk [vmem:[%s2908_s3 + $0x40] sm:$0xf] %vm1341_vm2, %v1619_v16  ;;  %v1622_v49 = vpack.c.bf16 %v1040_v3, %v1040_v3  ;;  %v1038_v60 = vmul.f32 %v1957_v21, %v2547_v58  ;;  %1978 = vpow2.f32 %v1533_v2  ;;  %v2742_v37 = vadd.f32 %v2058_v48, %v2484_v13 }
 0x139   :  { %v1961_v63 = vpop.eup %1960  ;;  %1390 = vst.msk [vmem:[%s2908_s3 + $0xc0] sm:$0xf] %vm1341_vm2, %v1651_v44  ;;  %v1654_v22 = vpack.c.bf16 %v1072_v11, %v1072_v11  ;;  %v878_v10 = vadd.f32 1.0, %v1959_v24  ;;  %1980 = vpow2.f32 %v1499_v46  ;;  %v2745_v19 = vadd.f32 %v2058_v48, %v2910_v9 }
 0x13a   :  { %v1963_v52 = vpop.eup %1962  ;;  %1361 = vst.msk [vmem:[%s2908_s3 + $0x4c] sm:$0xf] %vm1341_vm2, %v1622_v49  ;;  %v1620_v47 = vpack.c.bf16 %v1038_v60, %v1038_v60  ;;  %v851_v26 = vadd.f32 1.0, %v1961_v63  ;;  %1982 = vpow2.f32 %v1531_v8  ;;  %v2748_v40 = vadd.f32 %v2058_v48, %v2503_v14 }
 0x13b   :  { %v1965_v58 = vpop.eup %1964  ;;  %1393 = vst.msk [vmem:[%s2908_s3 + $0xcc] sm:$0xf] %vm1341_vm2, %v1654_v22  ;;  %1984 = vrcp.f32 %v878_v10  ;;  %v883_v15 = vadd.f32 1.0, %v1963_v52  ;;  %v2751_v1 = vadd.f32 %v2058_v48, %v2505_v18  ;;  %v2754_v5 = vadd.f32 %v2058_v48, %v2512_v6 }
 0x13c   :  { %v1967_v61 = vpop.eup %1966  ;;  %1359 = vst.msk [vmem:[%s2908_s3 + $0x44] sm:$0xf] %vm1341_vm2, %v1620_v47  ;;  %1986 = vrcp.f32 %v851_v26  ;;  %v849_v39 = vadd.f32 1.0, %v1965_v58  ;;  %v1502_v3 = vmul.f32 -1.442695, %v2733_v30 }
 0x13d   :  { %v1969_v35 = vpop.eup %1968  ;;  %1988 = vrcp.f32 %v883_v15  ;;  %v881_v33 = vadd.f32 1.0, %v1967_v61  ;;  %v1534_v8 = vmul.f32 -1.442695, %v2736_v43  ;;  %v1500_v44 = vmul.f32 -1.442695, %v2739_v34 }
 0x13e   :  { %v1971_v32 = vpop.eup %1970  ;;  %1990 = vrcp.f32 %v849_v39  ;;  %v852_v0 = vadd.f32 1.0, %v1969_v35  ;;  %v1532_v11 = vmul.f32 -1.442695, %v2742_v37  ;;  %v1505_v6 = vmul.f32 -1.442695, %v2745_v19 }
 0x13f   :  { %v1973_v54 = vpop.eup %1972  ;;  %1992 = vrcp.f32 %v881_v33  ;;  %v884_v42 = vadd.f32 1.0, %v1971_v32  ;;  %v1537_v49 = vmul.f32 -1.442695, %v2748_v40  ;;  %v1503_v22 = vmul.f32 -1.442695, %v2751_v1 }
 0x140   :  { %v1975_v29 = vpop.eup %1974  ;;  %1994 = vrcp.f32 %v852_v0  ;;  %v850_v45 = vadd.f32 1.0, %v1973_v54  ;;  %v1535_v10 = vmul.f32 -1.442695, %v2754_v5  ;;  %v2788_v32 = vadd.f32 %v2058_v48, %v2538_v57 }
 0x141   :  { %v1977_v41 = vpop.eup %1976  ;;  %1996 = vrcp.f32 %v884_v42  ;;  %v882_v31 = vadd.f32 1.0, %v1975_v29 }
 0x142   :  { %v1979_v2 = vpop.eup %1978  ;;  %1998 = vrcp.f32 %v850_v45  ;;  %v855_v50 = vadd.f32 1.0, %v1977_v41 }
 0x143   :  { %v1981_v7 = vpop.eup %1980  ;;  %2000 = vrcp.f32 %v882_v31  ;;  %v887_v46 = vadd.f32 1.0, %v1979_v2 }
 0x144   :  { %v1983_v13 = vpop.eup %1982  ;;  %2002 = vrcp.f32 %v855_v50  ;;  %v853_v16 = vadd.f32 1.0, %v1981_v7  ;;  %v1536_v50 = vmul.f32 -1.442695, %v2788_v32 }
 0x145   :  { %v1985_v21 = vpop.eup %1984  ;;  %2004 = vrcp.f32 %v887_v46  ;;  %v885_v14 = vadd.f32 1.0, %v1983_v13 }
 0x146   :  { %v1987_v24 = vpop.eup %1986  ;;  %v1070_v18 = vmul.f32 %v1985_v21, %v2601_v25  ;;  %2006 = vrcp.f32 %v853_v16  ;;  %v2768_v25 = vadd.f32 %v2058_v48, %v2514_v55  ;;  %v2780_v55 = vadd.f32 %v2058_v48, %v2527_v51 }
 0x147   :  { %v1989_v60 = vpop.eup %1988  ;;  %v1043_v63 = vmul.f32 %v1987_v24, %v2605_v4  ;;  %2008 = vrcp.f32 %v885_v14  ;;  %v2772_v4 = vadd.f32 %v2058_v48, %v2525_v56 }
 0x148   :  { %v1991_v52 = vpop.eup %1990  ;;  %v1652_v47 = vpack.c.bf16 %v1070_v18, %v1070_v18  ;;  %v1075_v26 = vmul.f32 %v1989_v60, %v2609_v12  ;;  %2010 = vpow2.f32 %v1502_v3  ;;  %v1506_v54 = vmul.f32 -1.442695, %v2768_v25 }
 0x149   :  { %v1993_v58 = vpop.eup %1992  ;;  %v1625_v15 = vpack.c.bf16 %v1043_v63, %v1043_v63  ;;  %v1041_v61 = vmul.f32 %v1991_v52, %v2614_v38  ;;  %2012 = vpow2.f32 %v1534_v8  ;;  %v1538_v29 = vmul.f32 -1.442695, %v2772_v4 }
 0x14a   :  { %v1995_v39 = vpop.eup %1994  ;;  %1391 = vst.msk [vmem:[%s2908_s3 + $0xc4] sm:$0xf] %vm1341_vm2, %v1652_v47  ;;  %v1657_v35 = vpack.c.bf16 %v1075_v26, %v1075_v26  ;;  %v1073_v12 = vmul.f32 %v1993_v58, %v2618_v36  ;;  %2014 = vpow2.f32 %v1500_v44  ;;  %v1504_v41 = vmul.f32 -1.442695, %v2780_v55 }
 0x14b   :  { %v1997_v33 = vpop.eup %1996  ;;  %1364 = vst.msk [vmem:[%s2908_s3 + $0x58] sm:$0xf] %vm1341_vm2, %v1625_v15  ;;  %v1623_v56 = vpack.c.bf16 %v1041_v61, %v1041_v61  ;;  %v1044_v38 = vmul.f32 %v1995_v39, %v2622_v27  ;;  %2016 = vpow2.f32 %v1532_v11 }
 0x14c   :  { %v1999_v0 = vpop.eup %1998  ;;  %1396 = vst.msk [vmem:[%s2908_s3 + $0xd8] sm:$0xf] %vm1341_vm2, %v1657_v35  ;;  %v1655_v51 = vpack.c.bf16 %v1073_v12, %v1073_v12  ;;  %v1076_v36 = vmul.f32 %v1997_v33, %v2626_v20  ;;  %2018 = vpow2.f32 %v1505_v6 }
 0x14d   :  { %v2001_v42 = vpop.eup %2000  ;;  %1362 = vst.msk [vmem:[%s2908_s3 + $0x50] sm:$0xf] %vm1341_vm2, %v1623_v56  ;;  %v1626_v57 = vpack.c.bf16 %v1044_v38, %v1044_v38  ;;  %v1042_v27 = vmul.f32 %v1999_v0, %v2630_v28  ;;  %2020 = vpow2.f32 %v1537_v49 }
 0x14e   :  { %v2003_v45 = vpop.eup %2002  ;;  %1394 = vst.msk [vmem:[%s2908_s3 + $0xd0] sm:$0xf] %vm1341_vm2, %v1655_v51  ;;  %v1658_v20 = vpack.c.bf16 %v1076_v36, %v1076_v36  ;;  %v1074_v48 = vmul.f32 %v2001_v42, %v2637_v62  ;;  %2022 = vpow2.f32 %v1503_v22 }
 0x14f   :  { %v2005_v31 = vpop.eup %2004  ;;  %1365 = vst.msk [vmem:[%s2908_s3 + $0x5c] sm:$0xf] %vm1341_vm2, %v1626_v57  ;;  %v1624_v28 = vpack.c.bf16 %v1042_v27, %v1042_v27  ;;  %v1047_v2 = vmul.f32 %v2003_v45, %v2648_v59  ;;  %2024 = vpow2.f32 %v1535_v10 }
 0x150   :  { %v2007_v9 = vpop.eup %2006  ;;  %1397 = vst.msk [vmem:[%s2908_s3 + $0xdc] sm:$0xf] %vm1341_vm2, %v1658_v20  ;;  %v1656_v62 = vpack.c.bf16 %v1074_v48, %v1074_v48  ;;  %v1079_v7 = vmul.f32 %v2005_v31, %v2659_v23  ;;  %2026 = vpow2.f32 %v1506_v54 }
 0x151   :  { %v2009_v46 = vpop.eup %2008  ;;  %1363 = vst.msk [vmem:[%s2908_s3 + $0x54] sm:$0xf] %vm1341_vm2, %v1624_v28  ;;  %v1629_v59 = vpack.c.bf16 %v1047_v2, %v1047_v2  ;;  %v1045_v13 = vmul.f32 %v2007_v9, %v2668_v17  ;;  %2028 = vpow2.f32 %v1538_v29 }
 0x152   :  { %v2011_v16 = vpop.eup %2010  ;;  %1395 = vst.msk [vmem:[%s2908_s3 + $0xd4] sm:$0xf] %vm1341_vm2, %v1656_v62  ;;  %v1661_v3 = vpack.c.bf16 %v1079_v7, %v1079_v7  ;;  %v1077_v23 = vmul.f32 %v2009_v46, %v2677_v53  ;;  %2030 = vpow2.f32 %v1504_v41 }
 0x153   :  { %v2013_v8 = vpop.eup %2012  ;;  %1368 = vst.msk [vmem:[%s2908_s3 + $0x68] sm:$0xf] %vm1341_vm2, %v1629_v59  ;;  %v1627_v21 = vpack.c.bf16 %v1045_v13, %v1045_v13  ;;  %v856_v14 = vadd.f32 1.0, %v2011_v16  ;;  %2032 = vpow2.f32 %v1536_v50 }
 0x154   :  { %v2015_v17 = vpop.eup %2014  ;;  %1400 = vst.msk [vmem:[%s2908_s3 + $0xe8] sm:$0xf] %vm1341_vm2, %v1661_v3  ;;  %v1659_v44 = vpack.c.bf16 %v1077_v23, %v1077_v23  ;;  %v888_v11 = vadd.f32 1.0, %v2013_v8 }
 0x155   :  { %v2017_v24 = vpop.eup %2016  ;;  %1366 = vst.msk [vmem:[%s2908_s3 + $0x60] sm:$0xf] %vm1341_vm2, %v1627_v21  ;;  %2034 = vrcp.f32 %v856_v14  ;;  %v854_v53 = vadd.f32 1.0, %v2015_v17 }
 0x156   :  { %v2019_v18 = vpop.eup %2018  ;;  %1398 = vst.msk [vmem:[%s2908_s3 + $0xe0] sm:$0xf] %vm1341_vm2, %v1659_v44  ;;  %2036 = vrcp.f32 %v888_v11  ;;  %v886_v6 = vadd.f32 1.0, %v2017_v24 }
 0x157   :  { %v2021_v49 = vpop.eup %2020  ;;  %2038 = vrcp.f32 %v854_v53  ;;  %v859_v60 = vadd.f32 1.0, %v2019_v18 }
 0x158   :  { %v2023_v63 = vpop.eup %2022  ;;  %2040 = vrcp.f32 %v886_v6  ;;  %v891_v22 = vadd.f32 1.0, %v2021_v49 }
 0x159   :  { %v2025_v10 = vpop.eup %2024  ;;  %2042 = vrcp.f32 %v859_v60  ;;  %v857_v52 = vadd.f32 1.0, %v2023_v63 }
 0x15a   :  { %v2027_v47 = vpop.eup %2026  ;;  %2044 = vrcp.f32 %v891_v22  ;;  %v889_v26 = vadd.f32 1.0, %v2025_v10 }
 0x15b   :  { %v2029_v58 = vpop.eup %2028  ;;  %2046 = vrcp.f32 %v857_v52  ;;  %v860_v15 = vadd.f32 1.0, %v2027_v47 }
 0x15c   :  { %v2031_v61 = vpop.eup %2030  ;;  %2048 = vrcp.f32 %v889_v26  ;;  %v892_v39 = vadd.f32 1.0, %v2029_v58 }
 0x15d   :  { %v2033_v35 = vpop.eup %2032  ;;  %2050 = vrcp.f32 %v860_v15  ;;  %v858_v12 = vadd.f32 1.0, %v2031_v61 }
 0x15e   :  { %2052 = vrcp.f32 %v892_v39  ;;  %v890_v33 = vadd.f32 1.0, %v2033_v35 }
 0x15f   :  { %v2035_v56 = vpop.eup %2034  ;;  %2054 = vrcp.f32 %v858_v12 }
 0x160   :  { %v2037_v38 = vpop.eup %2036  ;;  %v1048_v0 = vmul.f32 %v2035_v56, %v2733_v30  ;;  %2056 = vrcp.f32 %v890_v33 }
 0x161   :  { %v2039_v51 = vpop.eup %2038  ;;  %v1080_v36 = vmul.f32 %v2037_v38, %v2736_v43 }
 0x162   :  { %v2041_v54 = vpop.eup %2040  ;;  %v1630_v42 = vpack.c.bf16 %v1048_v0, %v1048_v0  ;;  %v1046_v57 = vmul.f32 %v2039_v51, %v2739_v34 }
 0x163   :  { %v2043_v27 = vpop.eup %2042  ;;  %v1662_v29 = vpack.c.bf16 %v1080_v36, %v1080_v36  ;;  %v1078_v45 = vmul.f32 %v2041_v54, %v2742_v37 }
 0x164   :  { %v2045_v20 = vpop.eup %2044  ;;  %1369 = vst.msk [vmem:[%s2908_s3 + $0x6c] sm:$0xf] %vm1341_vm2, %v1630_v42  ;;  %v1628_v48 = vpack.c.bf16 %v1046_v57, %v1046_v57  ;;  %v1051_v30 = vmul.f32 %v2043_v27, %v2745_v19 }
 0x165   :  { %v2047_v41 = vpop.eup %2046  ;;  %1401 = vst.msk [vmem:[%s2908_s3 + $0xec] sm:$0xf] %vm1341_vm2, %v1662_v29  ;;  %v1660_v43 = vpack.c.bf16 %v1078_v45, %v1078_v45  ;;  %v1083_v34 = vmul.f32 %v2045_v20, %v2748_v40 }
 0x166   :  { %v2049_v31 = vpop.eup %2048  ;;  %1367 = vst.msk [vmem:[%s2908_s3 + $0x64] sm:$0xf] %vm1341_vm2, %v1628_v48  ;;  %v1633_v37 = vpack.c.bf16 %v1051_v30, %v1051_v30  ;;  %v1049_v28 = vmul.f32 %v2047_v41, %v2751_v1 }
 0x167   :  { %v2051_v2 = vpop.eup %2050  ;;  %1399 = vst.msk [vmem:[%s2908_s3 + $0xe4] sm:$0xf] %vm1341_vm2, %v1660_v43  ;;  %v1665_v19 = vpack.c.bf16 %v1083_v34, %v1083_v34  ;;  %v1081_v50 = vmul.f32 %v2049_v31, %v2754_v5 }
 0x168   :  { %v2053_v9 = vpop.eup %2052  ;;  %1372 = vst.msk [vmem:[%s2908_s3 + $0x78] sm:$0xf] %vm1341_vm2, %v1633_v37  ;;  %v1631_v40 = vpack.c.bf16 %v1049_v28, %v1049_v28  ;;  %v1052_v62 = vmul.f32 %v2051_v2, %v2768_v25 }
 0x169   :  { %v2055_v7 = vpop.eup %2054  ;;  %1404 = vst.msk [vmem:[%s2908_s3 + $0xf8] sm:$0xf] %vm1341_vm2, %v1665_v19  ;;  %v1663_v1 = vpack.c.bf16 %v1081_v50, %v1081_v50  ;;  %v1084_v46 = vmul.f32 %v2053_v9, %v2772_v4 }
 0x16a   :  { %v2057_v59 = vpop.eup %2056  ;;  %1370 = vst.msk [vmem:[%s2908_s3 + $0x70] sm:$0xf] %vm1341_vm2, %v1631_v40  ;;  %v1634_v5 = vpack.c.bf16 %v1052_v62, %v1052_v62  ;;  %v1050_v13 = vmul.f32 %v2055_v7, %v2780_v55 }
 0x16b   :  { %1402 = vst.msk [vmem:[%s2908_s3 + $0xf0] sm:$0xf] %vm1341_vm2, %v1663_v1  ;;  %v1666_v25 = vpack.c.bf16 %v1084_v46, %v1084_v46  ;;  %v1082_v16 = vmul.f32 %v2057_v59, %v2788_v32 }
 0x16c   :  { %1373 = vst.msk [vmem:[%s2908_s3 + $0x7c] sm:$0xf] %vm1341_vm2, %v1634_v5  ;;  %v1632_v4 = vpack.c.bf16 %v1050_v13, %v1050_v13 }
 0x16d   :  { %1405 = vst.msk [vmem:[%s2908_s3 + $0xfc] sm:$0xf] %vm1341_vm2, %v1666_v25  ;;  %v1664_v55 = vpack.c.bf16 %v1082_v16, %v1082_v16 }
 0x16e   :  { %1371 = vst.msk [vmem:[%s2908_s3 + $0x74] sm:$0xf] %vm1341_vm2, %v1632_v4 }
 0x16f   :  { %1403 = vst.msk [vmem:[%s2908_s3 + $0xf4] sm:$0xf] %vm1341_vm2, %v1664_v55 }

</bundles_post_ra>
